<compile_context>
chip_gen: v5e
topology: v5e:2x2
jax: 0.10.0
libtpu: 0.0.40
codegen_flags: <defaults>
</compile_context>

<pallas_src>
import functools

import jax
import jax.numpy as jnp
from jax.experimental import pallas as pl
from jax.experimental.pallas import tpu as pltpu

_LANE = 128
# Max sublane rows per grid step.  512 rows x 128 lanes = 65536 columns/step:
# pred block (8,512,128) f32 = 2 MiB + side block (7,512,128) f32 = 1.75 MiB,
# x2 for double buffering ~= 7.5 MiB VMEM -> fits the 32 MiB scoped default on
# every generation, including v7x (64 MiB physical).
_MAX_M_CHUNK = 512


def _round_up(x, m):
    return ((x + m - 1) // m) * m


def _binrot_kernel(pred_ref, side_ref, o_ref, acc_ref, *, n_true, cols_per_step):
    """pred_ref: (8, m, 128) prediction channel planes (any float dtype).
       side_ref: (7, m, 128) f32 planes = [tbin1, tbin2, sin1, cos1, sin2, cos2, mask].
       o_ref:    (1,) f32 scalar loss in SMEM (written only on the last step).
       acc_ref:  (5, 8, 128) f32 VMEM partial sums: [ce, r1, w1, r2, w2]."""
    step = pl.program_id(0)

    @pl.when(step == 0)
    def _init():
        acc_ref[...] = jnp.zeros_like(acc_ref)

    pred = pred_ref[...].astype(jnp.float32)   # (8, m, 128), f32 compute
    side = side_ref[...]                       # (7, m, 128), f32

    p0, p1, p2, p3 = pred[0], pred[1], pred[2], pred[3]
    p4, p5, p6, p7 = pred[4], pred[5], pred[6], pred[7]
    tbin1, tbin2 = side[0], side[1]
    sin1, cos1 = side[2], side[3]
    sin2, cos2 = side[4], side[5]
    msk = side[6]

    m = p0.shape[0]

    # Validity of each column (padding beyond the true B*K rows contributes
    # nothing).  n_true / cols_per_step are static Python ints.
    col = (jax.lax.broadcasted_iota(jnp.int32, (m, _LANE), 0) * _LANE
           + jax.lax.broadcasted_iota(jnp.int32, (m, _LANE), 1)
           + step * cols_per_step)
    valid = (col < n_true).astype(jnp.float32)

    # ---- masked 2-class cross-entropy (reduction='mean' over ALL true rows) ----
    # CE(l0*m, l1*m ; t) = softplus((l_other - l_picked) * m), stable softplus.
    def softplus(x):
        return jnp.maximum(x, 0.0) + jnp.log(1.0 + jnp.exp(-jnp.abs(x)))

    x1 = (p1 - p0) * msk * (1.0 - 2.0 * tbin1)
    x2 = (p5 - p4) * msk * (1.0 - 2.0 * tbin2)
    ce = valid * (softplus(x1) + softplus(x2))

    # ---- smooth-L1 residual losses on rows where the bin target is nonzero ----
    def smooth_l1(d):
        ad = jnp.abs(d)
        return jnp.where(ad < 1.0, 0.5 * d * d, ad - 0.5)

    # Padded columns have tbin == 0 -> w == 0, so they never contribute here.
    w1 = (tbin1 != 0.0).astype(jnp.float32)
    w2 = (tbin2 != 0.0).astype(jnp.float32)
    r1 = w1 * (smooth_l1(p2 - sin1) + smooth_l1(p3 - cos1))
    r2 = w2 * (smooth_l1(p6 - sin2) + smooth_l1(p7 - cos2))

    # Vector accumulation: fold (m, 128) -> (8, 128) via vreg-wise adds only
    # (reshape splits the sublane-major dim, so no cross-lane/XLU traffic).
    def fold(q):
        return jnp.sum(q.reshape(m // 8, 8, _LANE), axis=0)

    acc_ref[0] += fold(ce)
    acc_ref[1] += fold(r1)
    acc_ref[2] += fold(w1)
    acc_ref[3] += fold(r2)
    acc_ref[4] += fold(w2)

    # Epilogue once, on the final grid step: cross-lane reduces, divisions,
    # selects and the scalar output write.
    @pl.when(step == pl.num_programs(0) - 1)
    def _finish():
        ce_total = jnp.sum(acc_ref[0])
        r1_total = jnp.sum(acc_ref[1])
        w1_total = jnp.sum(acc_ref[2])
        r2_total = jnp.sum(acc_ref[3])
        w2_total = jnp.sum(acc_ref[4])
        loss_bin = ce_total / float(n_true)
        res1 = jnp.where(w1_total > 0.0, r1_total / jnp.maximum(w1_total, 1.0), 0.0)
        res2 = jnp.where(w2_total > 0.0, r2_total / jnp.maximum(w2_total, 1.0), 0.0)
        o_ref[0] = loss_bin + res1 + res2


def _gather_feat_channel_major(output, ind):
    # output: (B, C, H, W) NCHW; ind: (B, K) flattened spatial indices.
    # Gathers directly from NCHW (no full feature-map transpose) -> (B, C, K).
    B, C, H, W = output.shape
    K = ind.shape[1]
    feat = output.reshape(B, C, H * W)
    idx = jnp.broadcast_to(ind[:, None, :].astype(jnp.int32), (B, C, K))
    return jnp.take_along_axis(feat, idx, axis=2)


def bin_rot_loss(output, mask, ind, rotbin, rotres):
    """output: (B, 8, H, W) float; mask: (B, K); ind: (B, K) int32;
    rotbin: (B, K, 2) int; rotres: (B, K, 2) float.  Returns scalar f32 loss."""
    B, C, H, W = output.shape
    K = ind.shape[1]
    assert C == 8
    N = B * K

    # (8, N) channel-major prediction slab; keeps the feature-map dtype
    # (e.g. bf16) through gather/pad/DMA -- the f32 cast happens in-kernel.
    pred = _gather_feat_channel_major(output, ind)            # (B, 8, K)
    pred = jnp.transpose(pred, (1, 0, 2)).reshape(8, N)       # (8, N)

    # Consolidated side slab (7, N) f32:
    #   rows = [tbin1, tbin2, sin(tres1), cos(tres1), sin(tres2), cos(tres2), mask]
    # sin/cos are precomputed here on the tiny (B,K,2) target (no in-kernel trig).
    tbin = rotbin.astype(jnp.float32).reshape(N, 2)
    tres = rotres.astype(jnp.float32).reshape(N, 2)
    msk = mask.astype(jnp.float32).reshape(N)
    side = jnp.stack(
        [tbin[:, 0], tbin[:, 1],
         jnp.sin(tres[:, 0]), jnp.cos(tres[:, 0]),
         jnp.sin(tres[:, 1]), jnp.cos(tres[:, 1]),
         msk],
        axis=0)                                               # (7, N) f32

    # Sublane-dense layout: pad the column axis and fold it into (M, 128) planes.
    M = -(-N // _LANE)
    m_chunk = min(_MAX_M_CHUNK, _round_up(M, 8))              # multiple of 8 sublanes
    m_pad = _round_up(M, m_chunk)
    n_pad = m_pad * _LANE
    num_chunks = m_pad // m_chunk
    cols_per_step = m_chunk * _LANE

    pred = jnp.pad(pred, ((0, 0), (0, n_pad - N))).reshape(8, m_pad, _LANE)
    side = jnp.pad(side, ((0, 0), (0, n_pad - N))).reshape(7, m_pad, _LANE)

    kernel = functools.partial(_binrot_kernel, n_true=N, cols_per_step=cols_per_step)

    loss = pl.pallas_call(
        kernel,
        out_shape=jax.ShapeDtypeStruct((1,), jnp.float32),
        grid=(num_chunks,),
        in_specs=[
            pl.BlockSpec((8, m_chunk, _LANE), lambda i: (0, i, 0)),
            pl.BlockSpec((7, m_chunk, _LANE), lambda i: (0, i, 0)),
        ],
        out_specs=pl.BlockSpec((1,), lambda i: (0,),
                               memory_space=pltpu.MemorySpace.SMEM),
        scratch_shapes=[pltpu.VMEM((5, 8, _LANE), jnp.float32)],
        compiler_params=pltpu.CompilerParams(
            dimension_semantics=("arbitrary",)),
    )(pred, side)
    return loss[0]


def _reference(output, mask, ind, rotbin, rotres):
    # Pure-JAX reference mirroring the PyTorch BinRotLoss forward.
    B, C, H, W = output.shape
    K = ind.shape[1]
    feat = output.reshape(B, C, H * W)
    idx = jnp.broadcast_to(ind[:, None, :].astype(jnp.int32), (B, C, K))
    pred = jnp.take_along_axis(feat, idx, axis=2)                 # (B, C, K)
    pred = jnp.transpose(pred, (0, 2, 1)).reshape(-1, 8).astype(jnp.float32)
    tbin = rotbin.reshape(-1, 2)
    tres = rotres.reshape(-1, 2).astype(jnp.float32)
    m = mask.reshape(-1, 1).astype(jnp.float32)

    def ce(logits2, tgt):
        logits2 = logits2 * m
        lse = jax.nn.logsumexp(logits2, axis=1)
        picked = jnp.take_along_axis(logits2, tgt[:, None].astype(jnp.int32), axis=1)[:, 0]
        return jnp.mean(lse - picked)

    def sl1(d):
        ad = jnp.abs(d)
        return jnp.where(ad < 1.0, 0.5 * d * d, ad - 0.5)

    loss = ce(pred[:, 0:2], tbin[:, 0]) + ce(pred[:, 4:6], tbin[:, 1])
    for b, (ci, cj) in ((0, (2, 3)), (1, (6, 7))):
        sel = (tbin[:, b] != 0).astype(jnp.float32)
        cnt = jnp.sum(sel)
        r = jnp.sum(sel * (sl1(pred[:, ci] - jnp.sin(tres[:, b]))
                           + sl1(pred[:, cj] - jnp.cos(tres[:, b]))))
        loss = loss + jnp.where(cnt > 0, r / jnp.maximum(cnt, 1.0), 0.0)
    return loss


if __name__ == "__main__":
    key = jax.random.PRNGKey(0)
    k1, k2, k3, k4, k5 = jax.random.split(key, 5)

    B, C, H, W, K = 2, 8, 16, 16, 8   # BinRotLoss has no parameters
    output = jax.random.normal(k1, (B, C, H, W), dtype=jnp.float32)
    ind = jax.random.randint(k2, (B, K), 0, H * W, dtype=jnp.int32)
    mask = jax.random.bernoulli(k3, 0.7, (B, K)).astype(jnp.float32)
    rotbin = jax.random.randint(k4, (B, K, 2), 0, 2, dtype=jnp.int32)
    rotres = jax.random.uniform(k5, (B, K, 2), minval=-1.0, maxval=1.0,
                                dtype=jnp.float32)

    loss = bin_rot_loss(output, mask, ind, rotbin, rotres)
    jax.block_until_ready(loss)

    ref = float(_reference(output, mask, ind, rotbin, rotres))
    if abs(float(loss) - ref) > 1e-4:
        raise SystemExit(f"MISMATCH: pallas={float(loss)} reference={ref}")
    print("KERNEL_OK")
</pallas_src>

<mosaic_0001>
module attributes {stable_mosaic.version = 11 : i64} {
  func.func @_binrot_kernel(%arg0: i32, %arg1: memref<8x8x128xf32, #tpu.memory_space<vmem>>, %arg2: memref<7x8x128xf32, #tpu.memory_space<vmem>>, %arg3: memref<1xf32, #tpu.memory_space<smem>>, %arg4: memref<5x8x128xf32, #tpu.memory_space<vmem>>) attributes {dimension_semantics = [#tpu.dimension_semantics<arbitrary>], iteration_bounds = array<i64: 1>, scalar_prefetch = 0 : i64, scratch_operands = 1 : i64, tpu.core_type = #tpu.core_type<tc>, window_params = [{transform_indices = @transform_0, window_bounds = array<i64: 8, 8, 128>}, {transform_indices = @transform_1, window_bounds = array<i64: 7, 8, 128>}, {transform_indices = @transform_2, window_bounds = array<i64: 1>}]} {
    %c0_i32 = arith.constant 0 : i32
    %0 = arith.cmpi eq, %arg0, %c0_i32 : i32
    %1 = arith.extui %0 : i1 to i32
    %c0_i32_0 = arith.constant 0 : i32
    %2 = arith.cmpi ne, %1, %c0_i32_0 : i32
    scf.if %2 {
      %cst_62 = arith.constant 0.000000e+00 : f32
      %178 = vector.broadcast %cst_62 : f32 to vector<5x8x128xf32>
      %c0_63 = arith.constant 0 : index
      %c0_64 = arith.constant 0 : index
      %c0_65 = arith.constant 0 : index
      %179 = vector.load %arg4[%c0_63, %c0_64, %c0_65] : memref<5x8x128xf32, #tpu.memory_space<vmem>>, vector<5x8x128xf32>
      tpu.vector_store %arg4[%c0_63, %c0_64, %c0_65], %178 {strides = array<i32>} : memref<5x8x128xf32, #tpu.memory_space<vmem>>, vector<5x8x128xf32>,
    } else {
    }
    %c0 = arith.constant 0 : index
    %c0_1 = arith.constant 0 : index
    %c0_2 = arith.constant 0 : index
    %3 = vector.load %arg1[%c0, %c0_1, %c0_2] : memref<8x8x128xf32, #tpu.memory_space<vmem>>, vector<8x8x128xf32>
    %c0_3 = arith.constant 0 : index
    %c0_4 = arith.constant 0 : index
    %c0_5 = arith.constant 0 : index
    %4 = vector.load %arg2[%c0_3, %c0_4, %c0_5] : memref<7x8x128xf32, #tpu.memory_space<vmem>>, vector<7x8x128xf32>
    %5 = vector.extract_strided_slice %3 {offsets = [0, 0, 0], sizes = [1, 8, 128], strides = [1, 1, 1]} : vector<8x8x128xf32> to vector<1x8x128xf32>
    %6 = vector.shape_cast %5 : vector<1x8x128xf32> to vector<8x128xf32>
    %7 = vector.extract_strided_slice %3 {offsets = [1, 0, 0], sizes = [1, 8, 128], strides = [1, 1, 1]} : vector<8x8x128xf32> to vector<1x8x128xf32>
    %8 = vector.shape_cast %7 : vector<1x8x128xf32> to vector<8x128xf32>
    %9 = vector.extract_strided_slice %3 {offsets = [2, 0, 0], sizes = [1, 8, 128], strides = [1, 1, 1]} : vector<8x8x128xf32> to vector<1x8x128xf32>
    %10 = vector.shape_cast %9 : vector<1x8x128xf32> to vector<8x128xf32>
    %11 = vector.extract_strided_slice %3 {offsets = [3, 0, 0], sizes = [1, 8, 128], strides = [1, 1, 1]} : vector<8x8x128xf32> to vector<1x8x128xf32>
    %12 = vector.shape_cast %11 : vector<1x8x128xf32> to vector<8x128xf32>
    %13 = vector.extract_strided_slice %3 {offsets = [4, 0, 0], sizes = [1, 8, 128], strides = [1, 1, 1]} : vector<8x8x128xf32> to vector<1x8x128xf32>
    %14 = vector.shape_cast %13 : vector<1x8x128xf32> to vector<8x128xf32>
    %15 = vector.extract_strided_slice %3 {offsets = [5, 0, 0], sizes = [1, 8, 128], strides = [1, 1, 1]} : vector<8x8x128xf32> to vector<1x8x128xf32>
    %16 = vector.shape_cast %15 : vector<1x8x128xf32> to vector<8x128xf32>
    %17 = vector.extract_strided_slice %3 {offsets = [6, 0, 0], sizes = [1, 8, 128], strides = [1, 1, 1]} : vector<8x8x128xf32> to vector<1x8x128xf32>
    %18 = vector.shape_cast %17 : vector<1x8x128xf32> to vector<8x128xf32>
    %19 = vector.extract_strided_slice %3 {offsets = [7, 0, 0], sizes = [1, 8, 128], strides = [1, 1, 1]} : vector<8x8x128xf32> to vector<1x8x128xf32>
    %20 = vector.shape_cast %19 : vector<1x8x128xf32> to vector<8x128xf32>
    %21 = vector.extract_strided_slice %4 {offsets = [0, 0, 0], sizes = [1, 8, 128], strides = [1, 1, 1]} : vector<7x8x128xf32> to vector<1x8x128xf32>
    %22 = vector.shape_cast %21 : vector<1x8x128xf32> to vector<8x128xf32>
    %23 = vector.extract_strided_slice %4 {offsets = [1, 0, 0], sizes = [1, 8, 128], strides = [1, 1, 1]} : vector<7x8x128xf32> to vector<1x8x128xf32>
    %24 = vector.shape_cast %23 : vector<1x8x128xf32> to vector<8x128xf32>
    %25 = vector.extract_strided_slice %4 {offsets = [2, 0, 0], sizes = [1, 8, 128], strides = [1, 1, 1]} : vector<7x8x128xf32> to vector<1x8x128xf32>
    %26 = vector.shape_cast %25 : vector<1x8x128xf32> to vector<8x128xf32>
    %27 = vector.extract_strided_slice %4 {offsets = [3, 0, 0], sizes = [1, 8, 128], strides = [1, 1, 1]} : vector<7x8x128xf32> to vector<1x8x128xf32>
    %28 = vector.shape_cast %27 : vector<1x8x128xf32> to vector<8x128xf32>
    %29 = vector.extract_strided_slice %4 {offsets = [4, 0, 0], sizes = [1, 8, 128], strides = [1, 1, 1]} : vector<7x8x128xf32> to vector<1x8x128xf32>
    %30 = vector.shape_cast %29 : vector<1x8x128xf32> to vector<8x128xf32>
    %31 = vector.extract_strided_slice %4 {offsets = [5, 0, 0], sizes = [1, 8, 128], strides = [1, 1, 1]} : vector<7x8x128xf32> to vector<1x8x128xf32>
    %32 = vector.shape_cast %31 : vector<1x8x128xf32> to vector<8x128xf32>
    %33 = vector.extract_strided_slice %4 {offsets = [6, 0, 0], sizes = [1, 8, 128], strides = [1, 1, 1]} : vector<7x8x128xf32> to vector<1x8x128xf32>
    %34 = vector.shape_cast %33 : vector<1x8x128xf32> to vector<8x128xf32>
    %35 = tpu.iota {dimensions = array<i32: 0>} : vector<8x128xi32>
    %c128_i32 = arith.constant 128 : i32
    %36 = vector.broadcast %c128_i32 : i32 to vector<8x128xi32>
    %37 = arith.muli %35, %36 : vector<8x128xi32>
    %38 = tpu.iota {dimensions = array<i32: 1>} : vector<8x128xi32>
    %39 = arith.addi %37, %38 : vector<8x128xi32>
    %c1024_i32 = arith.constant 1024 : i32
    %40 = arith.muli %arg0, %c1024_i32 : i32
    %41 = vector.broadcast %40 : i32 to vector<8x128xi32>
    %42 = arith.addi %39, %41 : vector<8x128xi32>
    %c16_i32 = arith.constant 16 : i32
    %43 = vector.broadcast %c16_i32 : i32 to vector<8x128xi32>
    %44 = arith.cmpi slt, %42, %43 : vector<8x128xi32>
    %45 = arith.extui %44 : vector<8x128xi1> to vector<8x128xi32>
    %46 = arith.sitofp %45 : vector<8x128xi32> to vector<8x128xf32>
    %47 = arith.subf %8, %6 : vector<8x128xf32>
    %48 = arith.mulf %47, %34 : vector<8x128xf32>
    %cst = arith.constant 2.000000e+00 : f32
    %49 = vector.broadcast %cst : f32 to vector<8x128xf32>
    %50 = arith.mulf %49, %22 : vector<8x128xf32>
    %cst_6 = arith.constant 1.000000e+00 : f32
    %51 = vector.broadcast %cst_6 : f32 to vector<8x128xf32>
    %52 = arith.subf %51, %50 : vector<8x128xf32>
    %53 = arith.mulf %48, %52 : vector<8x128xf32>
    %54 = arith.subf %16, %14 : vector<8x128xf32>
    %55 = arith.mulf %54, %34 : vector<8x128xf32>
    %cst_7 = arith.constant 2.000000e+00 : f32
    %56 = vector.broadcast %cst_7 : f32 to vector<8x128xf32>
    %57 = arith.mulf %56, %24 : vector<8x128xf32>
    %cst_8 = arith.constant 1.000000e+00 : f32
    %58 = vector.broadcast %cst_8 : f32 to vector<8x128xf32>
    %59 = arith.subf %58, %57 : vector<8x128xf32>
    %60 = arith.mulf %55, %59 : vector<8x128xf32>
    %cst_9 = arith.constant 0.000000e+00 : f32
    %61 = vector.broadcast %cst_9 : f32 to vector<8x128xf32>
    %62 = arith.maximumf %53, %61 : vector<8x128xf32>
    %63 = math.absf %53 : vector<8x128xf32>
    %cst_10 = arith.constant 0.000000e+00 : f32
    %64 = vector.broadcast %cst_10 : f32 to vector<8x128xf32>
    %65 = arith.subf %64, %63 : vector<8x128xf32>
    %66 = math.exp %65 : vector<8x128xf32>
    %cst_11 = arith.constant 1.000000e+00 : f32
    %67 = vector.broadcast %cst_11 : f32 to vector<8x128xf32>
    %68 = arith.addf %67, %66 : vector<8x128xf32>
    %69 = math.log %68 : vector<8x128xf32>
    %70 = arith.addf %62, %69 : vector<8x128xf32>
    %cst_12 = arith.constant 0.000000e+00 : f32
    %71 = vector.broadcast %cst_12 : f32 to vector<8x128xf32>
    %72 = arith.maximumf %60, %71 : vector<8x128xf32>
    %73 = math.absf %60 : vector<8x128xf32>
    %cst_13 = arith.constant 0.000000e+00 : f32
    %74 = vector.broadcast %cst_13 : f32 to vector<8x128xf32>
    %75 = arith.subf %74, %73 : vector<8x128xf32>
    %76 = math.exp %75 : vector<8x128xf32>
    %cst_14 = arith.constant 1.000000e+00 : f32
    %77 = vector.broadcast %cst_14 : f32 to vector<8x128xf32>
    %78 = arith.addf %77, %76 : vector<8x128xf32>
    %79 = math.log %78 : vector<8x128xf32>
    %80 = arith.addf %72, %79 : vector<8x128xf32>
    %81 = arith.addf %70, %80 : vector<8x128xf32>
    %82 = arith.mulf %46, %81 : vector<8x128xf32>
    %cst_15 = arith.constant 0.000000e+00 : f32
    %83 = vector.broadcast %cst_15 : f32 to vector<8x128xf32>
    %84 = arith.cmpf one, %22, %83 : vector<8x128xf32>
    %85 = arith.extui %84 : vector<8x128xi1> to vector<8x128xi32>
    %86 = arith.sitofp %85 : vector<8x128xi32> to vector<8x128xf32>
    %cst_16 = arith.constant 0.000000e+00 : f32
    %87 = vector.broadcast %cst_16 : f32 to vector<8x128xf32>
    %88 = arith.cmpf one, %24, %87 : vector<8x128xf32>
    %89 = arith.extui %88 : vector<8x128xi1> to vector<8x128xi32>
    %90 = arith.sitofp %89 : vector<8x128xi32> to vector<8x128xf32>
    %91 = arith.subf %10, %26 : vector<8x128xf32>
    %92 = math.absf %91 : vector<8x128xf32>
    %cst_17 = arith.constant 1.000000e+00 : f32
    %93 = vector.broadcast %cst_17 : f32 to vector<8x128xf32>
    %94 = arith.cmpf olt, %92, %93 : vector<8x128xf32>
    %cst_18 = arith.constant 5.000000e-01 : f32
    %95 = vector.broadcast %cst_18 : f32 to vector<8x128xf32>
    %96 = arith.mulf %95, %91 : vector<8x128xf32>
    %97 = arith.mulf %96, %91 : vector<8x128xf32>
    %cst_19 = arith.constant 5.000000e-01 : f32
    %98 = vector.broadcast %cst_19 : f32 to vector<8x128xf32>
    %99 = arith.subf %92, %98 : vector<8x128xf32>
    %100 = arith.select %94, %97, %99 : vector<8x128xi1>, vector<8x128xf32>
    %101 = arith.subf %12, %28 : vector<8x128xf32>
    %102 = math.absf %101 : vector<8x128xf32>
    %cst_20 = arith.constant 1.000000e+00 : f32
    %103 = vector.broadcast %cst_20 : f32 to vector<8x128xf32>
    %104 = arith.cmpf olt, %102, %103 : vector<8x128xf32>
    %cst_21 = arith.constant 5.000000e-01 : f32
    %105 = vector.broadcast %cst_21 : f32 to vector<8x128xf32>
    %106 = arith.mulf %105, %101 : vector<8x128xf32>
    %107 = arith.mulf %106, %101 : vector<8x128xf32>
    %cst_22 = arith.constant 5.000000e-01 : f32
    %108 = vector.broadcast %cst_22 : f32 to vector<8x128xf32>
    %109 = arith.subf %102, %108 : vector<8x128xf32>
    %110 = arith.select %104, %107, %109 : vector<8x128xi1>, vector<8x128xf32>
    %111 = arith.addf %100, %110 : vector<8x128xf32>
    %112 = arith.mulf %86, %111 : vector<8x128xf32>
    %113 = arith.subf %18, %30 : vector<8x128xf32>
    %114 = math.absf %113 : vector<8x128xf32>
    %cst_23 = arith.constant 1.000000e+00 : f32
    %115 = vector.broadcast %cst_23 : f32 to vector<8x128xf32>
    %116 = arith.cmpf olt, %114, %115 : vector<8x128xf32>
    %cst_24 = arith.constant 5.000000e-01 : f32
    %117 = vector.broadcast %cst_24 : f32 to vector<8x128xf32>
    %118 = arith.mulf %117, %113 : vector<8x128xf32>
    %119 = arith.mulf %118, %113 : vector<8x128xf32>
    %cst_25 = arith.constant 5.000000e-01 : f32
    %120 = vector.broadcast %cst_25 : f32 to vector<8x128xf32>
    %121 = arith.subf %114, %120 : vector<8x128xf32>
    %122 = arith.select %116, %119, %121 : vector<8x128xi1>, vector<8x128xf32>
    %123 = arith.subf %20, %32 : vector<8x128xf32>
    %124 = math.absf %123 : vector<8x128xf32>
    %cst_26 = arith.constant 1.000000e+00 : f32
    %125 = vector.broadcast %cst_26 : f32 to vector<8x128xf32>
    %126 = arith.cmpf olt, %124, %125 : vector<8x128xf32>
    %cst_27 = arith.constant 5.000000e-01 : f32
    %127 = vector.broadcast %cst_27 : f32 to vector<8x128xf32>
    %128 = arith.mulf %127, %123 : vector<8x128xf32>
    %129 = arith.mulf %128, %123 : vector<8x128xf32>
    %cst_28 = arith.constant 5.000000e-01 : f32
    %130 = vector.broadcast %cst_28 : f32 to vector<8x128xf32>
    %131 = arith.subf %124, %130 : vector<8x128xf32>
    %132 = arith.select %126, %129, %131 : vector<8x128xi1>, vector<8x128xf32>
    %133 = arith.addf %122, %132 : vector<8x128xf32>
    %134 = arith.mulf %90, %133 : vector<8x128xf32>
    %c0_29 = arith.constant 0 : index
    %c0_30 = arith.constant 0 : index
    %c0_31 = arith.constant 0 : index
    %135 = vector.load %arg4[%c0_29, %c0_30, %c0_31] : memref<5x8x128xf32, #tpu.memory_space<vmem>>, vector<1x8x128xf32>
    %136 = vector.shape_cast %135 : vector<1x8x128xf32> to vector<8x128xf32>
    %137 = vector.shape_cast %82 : vector<8x128xf32> to vector<1x8x128xf32>
    %cst_32 = arith.constant dense<0.000000e+00> : vector<8x128xf32>
    %138 = vector.multi_reduction <add>, %137, %cst_32 [0] : vector<1x8x128xf32> to vector<8x128xf32>
    %139 = arith.addf %136, %138 : vector<8x128xf32>
    %c0_33 = arith.constant 0 : index
    %c0_34 = arith.constant 0 : index
    %c0_35 = arith.constant 0 : index
    %140 = vector.load %arg4[%c0_33, %c0_34, %c0_35] : memref<5x8x128xf32, #tpu.memory_space<vmem>>, vector<1x8x128xf32>
    %141 = vector.shape_cast %140 : vector<1x8x128xf32> to vector<8x128xf32>
    %142 = vector.shape_cast %139 : vector<8x128xf32> to vector<1x8x128xf32>
    tpu.vector_store %arg4[%c0_33, %c0_34, %c0_35], %142 {strides = array<i32>} : memref<5x8x128xf32, #tpu.memory_space<vmem>>, vector<1x8x128xf32>,
    %c1 = arith.constant 1 : index
    %c0_36 = arith.constant 0 : index
    %c0_37 = arith.constant 0 : index
    %143 = vector.load %arg4[%c1, %c0_36, %c0_37] : memref<5x8x128xf32, #tpu.memory_space<vmem>>, vector<1x8x128xf32>
    %144 = vector.shape_cast %143 : vector<1x8x128xf32> to vector<8x128xf32>
    %145 = vector.shape_cast %112 : vector<8x128xf32> to vector<1x8x128xf32>
    %cst_38 = arith.constant dense<0.000000e+00> : vector<8x128xf32>
    %146 = vector.multi_reduction <add>, %145, %cst_38 [0] : vector<1x8x128xf32> to vector<8x128xf32>
    %147 = arith.addf %144, %146 : vector<8x128xf32>
    %c1_39 = arith.constant 1 : index
    %c0_40 = arith.constant 0 : index
    %c0_41 = arith.constant 0 : index
    %148 = vector.load %arg4[%c1_39, %c0_40, %c0_41] : memref<5x8x128xf32, #tpu.memory_space<vmem>>, vector<1x8x128xf32>
    %149 = vector.shape_cast %148 : vector<1x8x128xf32> to vector<8x128xf32>
    %150 = vector.shape_cast %147 : vector<8x128xf32> to vector<1x8x128xf32>
    tpu.vector_store %arg4[%c1_39, %c0_40, %c0_41], %150 {strides = array<i32>} : memref<5x8x128xf32, #tpu.memory_space<vmem>>, vector<1x8x128xf32>,
    %c2 = arith.constant 2 : index
    %c0_42 = arith.constant 0 : index
    %c0_43 = arith.constant 0 : index
    %151 = vector.load %arg4[%c2, %c0_42, %c0_43] : memref<5x8x128xf32, #tpu.memory_space<vmem>>, vector<1x8x128xf32>
    %152 = vector.shape_cast %151 : vector<1x8x128xf32> to vector<8x128xf32>
    %153 = vector.shape_cast %86 : vector<8x128xf32> to vector<1x8x128xf32>
    %cst_44 = arith.constant dense<0.000000e+00> : vector<8x128xf32>
    %154 = vector.multi_reduction <add>, %153, %cst_44 [0] : vector<1x8x128xf32> to vector<8x128xf32>
    %155 = arith.addf %152, %154 : vector<8x128xf32>
    %c2_45 = arith.constant 2 : index
    %c0_46 = arith.constant 0 : index
    %c0_47 = arith.constant 0 : index
    %156 = vector.load %arg4[%c2_45, %c0_46, %c0_47] : memref<5x8x128xf32, #tpu.memory_space<vmem>>, vector<1x8x128xf32>
    %157 = vector.shape_cast %156 : vector<1x8x128xf32> to vector<8x128xf32>
    %158 = vector.shape_cast %155 : vector<8x128xf32> to vector<1x8x128xf32>
    tpu.vector_store %arg4[%c2_45, %c0_46, %c0_47], %158 {strides = array<i32>} : memref<5x8x128xf32, #tpu.memory_space<vmem>>, vector<1x8x128xf32>,
    %c3 = arith.constant 3 : index
    %c0_48 = arith.constant 0 : index
    %c0_49 = arith.constant 0 : index
    %159 = vector.load %arg4[%c3, %c0_48, %c0_49] : memref<5x8x128xf32, #tpu.memory_space<vmem>>, vector<1x8x128xf32>
    %160 = vector.shape_cast %159 : vector<1x8x128xf32> to vector<8x128xf32>
    %161 = vector.shape_cast %134 : vector<8x128xf32> to vector<1x8x128xf32>
    %cst_50 = arith.constant dense<0.000000e+00> : vector<8x128xf32>
    %162 = vector.multi_reduction <add>, %161, %cst_50 [0] : vector<1x8x128xf32> to vector<8x128xf32>
    %163 = arith.addf %160, %162 : vector<8x128xf32>
    %c3_51 = arith.constant 3 : index
    %c0_52 = arith.constant 0 : index
    %c0_53 = arith.constant 0 : index
    %164 = vector.load %arg4[%c3_51, %c0_52, %c0_53] : memref<5x8x128xf32, #tpu.memory_space<vmem>>, vector<1x8x128xf32>
    %165 = vector.shape_cast %164 : vector<1x8x128xf32> to vector<8x128xf32>
    %166 = vector.shape_cast %163 : vector<8x128xf32> to vector<1x8x128xf32>
    tpu.vector_store %arg4[%c3_51, %c0_52, %c0_53], %166 {strides = array<i32>} : memref<5x8x128xf32, #tpu.memory_space<vmem>>, vector<1x8x128xf32>,
    %c4 = arith.constant 4 : index
    %c0_54 = arith.constant 0 : index
    %c0_55 = arith.constant 0 : index
    %167 = vector.load %arg4[%c4, %c0_54, %c0_55] : memref<5x8x128xf32, #tpu.memory_space<vmem>>, vector<1x8x128xf32>
    %168 = vector.shape_cast %167 : vector<1x8x128xf32> to vector<8x128xf32>
    %169 = vector.shape_cast %90 : vector<8x128xf32> to vector<1x8x128xf32>
    %cst_56 = arith.constant dense<0.000000e+00> : vector<8x128xf32>
    %170 = vector.multi_reduction <add>, %169, %cst_56 [0] : vector<1x8x128xf32> to vector<8x128xf32>
    %171 = arith.addf %168, %170 : vector<8x128xf32>
    %c4_57 = arith.constant 4 : index
    %c0_58 = arith.constant 0 : index
    %c0_59 = arith.constant 0 : index
    %172 = vector.load %arg4[%c4_57, %c0_58, %c0_59] : memref<5x8x128xf32, #tpu.memory_space<vmem>>, vector<1x8x128xf32>
    %173 = vector.shape_cast %172 : vector<1x8x128xf32> to vector<8x128xf32>
    %174 = vector.shape_cast %171 : vector<8x128xf32> to vector<1x8x128xf32>
    tpu.vector_store %arg4[%c4_57, %c0_58, %c0_59], %174 {strides = array<i32>} : memref<5x8x128xf32, #tpu.memory_space<vmem>>, vector<1x8x128xf32>,
    %c0_i32_60 = arith.constant 0 : i32
    %175 = arith.cmpi eq, %arg0, %c0_i32_60 : i32
    %176 = arith.extui %175 : i1 to i32
    %c0_i32_61 = arith.constant 0 : i32
    %177 = arith.cmpi ne, %176, %c0_i32_61 : i32
    scf.if %177 {
      %c0_62 = arith.constant 0 : index
      %c0_63 = arith.constant 0 : index
      %c0_64 = arith.constant 0 : index
      %178 = vector.load %arg4[%c0_62, %c0_63, %c0_64] : memref<5x8x128xf32, #tpu.memory_space<vmem>>, vector<1x8x128xf32>
      %179 = vector.shape_cast %178 : vector<1x8x128xf32> to vector<8x128xf32>
      %180 = vector.shape_cast %179 : vector<8x128xf32> to vector<1x8x128xf32>
      %cst_65 = arith.constant dense<0.000000e+00> : vector<1xf32>
      %181 = vector.multi_reduction <add>, %180, %cst_65 [1, 2] : vector<1x8x128xf32> to vector<1xf32>
      %182 = vector.shape_cast %181 : vector<1xf32> to vector<1x1x1xf32>
      %183 = vector.extract %182[0, 0, 0] : f32 from vector<1x1x1xf32>
      %c1_66 = arith.constant 1 : index
      %c0_67 = arith.constant 0 : index
      %c0_68 = arith.constant 0 : index
      %184 = vector.load %arg4[%c1_66, %c0_67, %c0_68] : memref<5x8x128xf32, #tpu.memory_space<vmem>>, vector<1x8x128xf32>
      %185 = vector.shape_cast %184 : vector<1x8x128xf32> to vector<8x128xf32>
      %186 = vector.shape_cast %185 : vector<8x128xf32> to vector<1x8x128xf32>
      %cst_69 = arith.constant dense<0.000000e+00> : vector<1xf32>
      %187 = vector.multi_reduction <add>, %186, %cst_69 [1, 2] : vector<1x8x128xf32> to vector<1xf32>
      %188 = vector.shape_cast %187 : vector<1xf32> to vector<1x1x1xf32>
      %189 = vector.extract %188[0, 0, 0] : f32 from vector<1x1x1xf32>
      %c2_70 = arith.constant 2 : index
      %c0_71 = arith.constant 0 : index
      %c0_72 = arith.constant 0 : index
      %190 = vector.load %arg4[%c2_70, %c0_71, %c0_72] : memref<5x8x128xf32, #tpu.memory_space<vmem>>, vector<1x8x128xf32>
      %191 = vector.shape_cast %190 : vector<1x8x128xf32> to vector<8x128xf32>
      %192 = vector.shape_cast %191 : vector<8x128xf32> to vector<1x8x128xf32>
      %cst_73 = arith.constant dense<0.000000e+00> : vector<1xf32>
      %193 = vector.multi_reduction <add>, %192, %cst_73 [1, 2] : vector<1x8x128xf32> to vector<1xf32>
      %194 = vector.shape_cast %193 : vector<1xf32> to vector<1x1x1xf32>
      %195 = vector.extract %194[0, 0, 0] : f32 from vector<1x1x1xf32>
      %c3_74 = arith.constant 3 : index
      %c0_75 = arith.constant 0 : index
      %c0_76 = arith.constant 0 : index
      %196 = vector.load %arg4[%c3_74, %c0_75, %c0_76] : memref<5x8x128xf32, #tpu.memory_space<vmem>>, vector<1x8x128xf32>
      %197 = vector.shape_cast %196 : vector<1x8x128xf32> to vector<8x128xf32>
      %198 = vector.shape_cast %197 : vector<8x128xf32> to vector<1x8x128xf32>
      %cst_77 = arith.constant dense<0.000000e+00> : vector<1xf32>
      %199 = vector.multi_reduction <add>, %198, %cst_77 [1, 2] : vector<1x8x128xf32> to vector<1xf32>
      %200 = vector.shape_cast %199 : vector<1xf32> to vector<1x1x1xf32>
      %201 = vector.extract %200[0, 0, 0] : f32 from vector<1x1x1xf32>
      %c4_78 = arith.constant 4 : index
      %c0_79 = arith.constant 0 : index
      %c0_80 = arith.constant 0 : index
      %202 = vector.load %arg4[%c4_78, %c0_79, %c0_80] : memref<5x8x128xf32, #tpu.memory_space<vmem>>, vector<1x8x128xf32>
      %203 = vector.shape_cast %202 : vector<1x8x128xf32> to vector<8x128xf32>
      %204 = vector.shape_cast %203 : vector<8x128xf32> to vector<1x8x128xf32>
      %cst_81 = arith.constant dense<0.000000e+00> : vector<1xf32>
      %205 = vector.multi_reduction <add>, %204, %cst_81 [1, 2] : vector<1x8x128xf32> to vector<1xf32>
      %206 = vector.shape_cast %205 : vector<1xf32> to vector<1x1x1xf32>
      %207 = vector.extract %206[0, 0, 0] : f32 from vector<1x1x1xf32>
      %cst_82 = arith.constant 1.600000e+01 : f32
      %208 = arith.divf %183, %cst_82 : f32
      %cst_83 = arith.constant 0.000000e+00 : f32
      %209 = arith.cmpf ogt, %195, %cst_83 : f32
      %cst_84 = arith.constant 1.000000e+00 : f32
      %210 = arith.maximumf %195, %cst_84 : f32
      %211 = arith.divf %189, %210 : f32
      %cst_85 = arith.constant 0.000000e+00 : f32
      %212 = arith.select %209, %211, %cst_85 : f32
      %cst_86 = arith.constant 0.000000e+00 : f32
      %213 = arith.cmpf ogt, %207, %cst_86 : f32
      %cst_87 = arith.constant 1.000000e+00 : f32
      %214 = arith.maximumf %207, %cst_87 : f32
      %215 = arith.divf %201, %214 : f32
      %cst_88 = arith.constant 0.000000e+00 : f32
      %216 = arith.select %213, %215, %cst_88 : f32
      %217 = arith.addf %208, %212 : f32
      %218 = arith.addf %217, %216 : f32
      %c0_89 = arith.constant 0 : index
      %219 = memref.load %arg3[%c0_89] : memref<1xf32, #tpu.memory_space<smem>>
      memref.store %218, %arg3[%c0_89] : memref<1xf32, #tpu.memory_space<smem>>
    } else {
    }
    return
  }
  func.func @transform_0(%arg0: i32) -> (i32, i32, i32) {
    %c0_i32 = arith.constant 0 : i32
    %c0_i32_0 = arith.constant 0 : i32
    %c0_i32_1 = arith.constant 0 : i32
    return %c0_i32, %arg0, %c0_i32_0 : i32, i32, i32
  }
  func.func @transform_1(%arg0: i32) -> (i32, i32, i32) {
    %c0_i32 = arith.constant 0 : i32
    %c0_i32_0 = arith.constant 0 : i32
    %c0_i32_1 = arith.constant 0 : i32
    return %c0_i32, %arg0, %c0_i32_0 : i32, i32, i32
  }
  func.func @transform_2(%arg0: i32) -> i32 {
    %c0_i32 = arith.constant 0 : i32
    %c0_i32_0 = arith.constant 0 : i32
    return %c0_i32 : i32
  }
}

</mosaic_0001>

<bundles_post_ra>
// kernel: tpu_custom_call.1
= control target key start
LH: loop header
LB: loop body
LE: loop exit
PB: predicated region body
PF: predicated region fallthrough
CT: control target
= control target key end

     0   :  { %7 = vsyncpa [#allocation4], 0  ;;  %s462_s0 = inlined_call_operand.hbm [shape: f32[8,8,128], index: 0, kind: input, shape index: {}]   ;;  %s463_s1 = inlined_call_operand.hbm [shape: f32[7,8,128], index: 1, kind: input, shape index: {}]   ;;  %s464_s2 = inlined_call_operand.hbm [shape: f32[1], index: 2, kind: output, shape index: {}]  }
   0x1   :  { %8 = vsyncpa [#allocation7], 0 }
   0x2   :  { %9 = vsyncpa [#allocation5], 0  ;;  %s14_s11 = sshll.u32 %s462_s0, 4  ;;  %s406_s12 = smov [#allocation3]   ;;  %s15_s11 = int_to_ptr.hbm [resolvable:$true] %s14_s11 }
   0x3   :  { %s16_s13 = sshll.u32 %s406_s12, 4  ;;  %s27_s16 = sshll.u32 %s463_s1, 4  ;;  %s17_s13 = int_to_ptr.vmem [resolvable:$true] %s16_s13  ;;  %s28_s16 = int_to_ptr.hbm [resolvable:$true] %s27_s16 }
   0x4   :  { %s407_s17 = smov 128   ;;  %s408_s18 = smov 8  }
   0x5   :  { %22 = dma.hbm_to_vmem [thread:$0]  %s15_s11, 1024, %s17_s13, [#allocation4], %s407_s17, %s407_s17, %s408_s18  }
   0x6   :  { %s409_s19 = smov [#allocation6]  }
   0x7   :  { %s29_s20 = sshll.u32 %s409_s19, 4  ;;  %s30_s20 = int_to_ptr.vmem [resolvable:$true] %s29_s20 }
   0x8   :  { %35 = dma.hbm_to_vmem [thread:$0]  %s28_s16, 896, %s30_s20, [#allocation7], %s407_s17, %s407_s17, %s408_s18  }
   0x9   :  { %400 = dma.done.wait [#allocation4], 1024  }
   0xa   :  { %401 = vsyncadd [#allocation4], 4294966272 }
   0xb   :  { %402 = dma.done.wait [#allocation7], 896  }
   0xc   :  { %403 = vsyncadd [#allocation7], 4294966400  ;;  %v61_v0 = vld [vmem:[#allocation6] sm:$0xff]  ;;  %v67_v1 = vld [vmem:[#allocation6 + $0x30] sm:$0xff]  ;;  %v410_v7 = vmov 0.0   ;;  %v68_v43 = vlaneseq  ;;  %s412_s22 = smov 1.0  }
   0xd   :  { %v53_v2 = vld [vmem:[#allocation3] sm:$0xff]  ;;  %vm110_vm0 = vcmp.ne.f32.partialorder %v61_v0, 0.0  ;;  %v54_v3 = vld [vmem:[#allocation3 + $0x8] sm:$0xff]  ;;  %v82_v4 = vmul.f32 2.0, %v61_v0  ;;  %v59_v12 = vld [vmem:[#allocation3 + $0x30] sm:$0xff]  ;;  %s283_s8 = sshll.u32 %s464_s2, 4  ;;  %s284_s8 = int_to_ptr.hbm [resolvable:$true] %s283_s8 }
   0xe   :  { %v57_v5 = vld [vmem:[#allocation3 + $0x20] sm:$0xff]  ;;  %v58_v6 = vld [vmem:[#allocation3 + $0x28] sm:$0xff]  ;;  %v436_v8 = vsel %vm110_vm0, 1.0, %v410_v7  ;;  %v80_v9 = vsub.f32 %v54_v3, %v53_v2  ;;  %v60_v13 = vld [vmem:[#allocation3 + $0x38] sm:$0xff]  ;;  %v69_v45 = vshrl.u32 %v68_v43, 7  ;;  %v72_v55 = vand.u32 127, %v68_v43 }
   0xf   :  { %v62_v10 = vld [vmem:[#allocation6 + $0x8] sm:$0xff]  ;;  %v85_v11 = vsub.f32 %v58_v6, %v57_v5  ;;  %196 = vadd.xlane.f32.xlu1 %v436_v8  ;;  %v83_v14 = vsub.f32 1.0, %v82_v4  ;;  %v65_v16 = vld [vmem:[#allocation6 + $0x20] sm:$0xff]  ;;  %v55_v47 = vld [vmem:[#allocation3 + $0x10] sm:$0xff]  ;;  %s413_s10 = smov [#allocation8]  }
  0x10   :  { %v87_v15 = vmul.f32 2.0, %v62_v10  ;;  %v66_v17 = vld [vmem:[#allocation6 + $0x28] sm:$0xff]  ;;  %v81_v18 = vmul.f32 %v80_v9, %v67_v1  ;;  %v132_v20 = vsub.f32 %v59_v12, %v65_v16  ;;  %vm113_vm1 = vcmp.ne.f32.partialorder %v62_v10, 0.0  ;;  %v63_v48 = vld [vmem:[#allocation6 + $0x10] sm:$0xff]  ;;  %v56_v51 = vld [vmem:[#allocation3 + $0x18] sm:$0xff] }
  0x11   :  { %v86_v19 = vmul.f32 %v85_v11, %v67_v1  ;;  %v139_v21 = vsub.f32 %v60_v13, %v66_v17  ;;  %v297_v30 = vsel %vm113_vm1, 1.0, %v410_v7  ;;  %v64_v52 = vld [vmem:[#allocation6 + $0x18] sm:$0xff]  ;;  %v70_v54 = vmul.u32 128, %v69_v45 }
  0x12   :  { %v88_v22 = vsub.f32 1.0, %v87_v15  ;;  %v84_v23 = vmul.f32 %v83_v14, %v81_v18  ;;  %v133_v24 = vand.u32 2147483647, %v132_v20  ;;  %v135_v25 = vmul.f32 0.5, %v132_v20  ;;  %216 = vadd.xlane.f32.xlu2 %v297_v30 }
  0x13   :  { %v140_v26 = vand.u32 2147483647, %v139_v21  ;;  %v142_v28 = vmul.f32 0.5, %v139_v21  ;;  %v116_v56 = vsub.f32 %v55_v47, %v63_v48  ;;  %v123_v57 = vsub.f32 %v56_v51, %v64_v52 }
  0x14   :  { %v89_v27 = vmul.f32 %v88_v22, %v86_v19  ;;  %v91_v29 = vand.u32 2147483647, %v84_v23  ;;  %vm134_vm2 = vcmp.lt.f32.partialorder %v133_v24, 1.0  ;;  %v136_v32 = vmul.f32 %v135_v25, %v132_v20 }
  0x15   :  { %v300_v33 = vadd.f32 -0.5, %v133_v24  ;;  %vm141_vm3 = vcmp.lt.f32.partialorder %v140_v26, 1.0  ;;  %v143_v35 = vmul.f32 %v142_v28, %v139_v21  ;;  %v301_v36 = vadd.f32 -0.5, %v140_v26 }
  0x16   :  { %v100_v31 = vand.u32 2147483647, %v89_v27  ;;  %v92_v34 = vsub.f32 0.0, %v91_v29  ;;  %v73_v58 = vadd.s32 %v72_v55, %v70_v54  ;;  %v117_v59 = vand.u32 2147483647, %v116_v56 }
  0x17   :  { %v138_v38 = vsel %vm134_vm2, %v136_v32, %v300_v33  ;;  %v145_v40 = vsel %vm141_vm3, %v143_v35, %v301_v36  ;;  %v90_v60 = vmax.f32 %v84_v23, 0.0  ;;  %v119_v61 = vmul.f32 0.5, %v116_v56 }
  0x18   :  { %v101_v37 = vsub.f32 0.0, %v100_v31  ;;  %v93_v39 = vmul.f32 1.442695, %v92_v34  ;;  %v146_v42 = vadd.f32 %v145_v40, %v138_v38  ;;  %v124_v62 = vand.u32 2147483647, %v123_v57 }
  0x19   :  { %v126_v63 = vmul.f32 0.5, %v123_v57  ;;  %v99_v1 = vmax.f32 %v89_v27, 0.0  ;;  %vm77_vm4 = vcmp.lt.s32.totalorder %v73_v58, 16  ;;  %v298_v5 = vadd.f32 -0.5, %v117_v59 }
  0x1a   :  { %v102_v41 = vmul.f32 1.442695, %v101_v37  ;;  %326 = vpow2.f32 %v93_v39  ;;  %v147_v44 = vmul.f32 %v297_v30, %v146_v42  ;;  %v120_v9 = vmul.f32 %v119_v61, %v116_v56 }
  0x1b   :  { %v127_v10 = vmul.f32 %v126_v63, %v123_v57  ;;  %v299_v11 = vadd.f32 -0.5, %v124_v62  ;;  %vm118_vm5 = vcmp.lt.f32.partialorder %v117_v59, 1.0  ;;  %vm125_vm6 = vcmp.lt.f32.partialorder %v124_v62, 1.0 }
  0x1c   :  { %328 = vpow2.f32 %v102_v41  ;;  %206 = vadd.xlane.f32.xlu1 %v147_v44  ;;  %v295_v13 = vsel %vm77_vm4, 1.0, %v410_v7  ;;  %v122_v15 = vsel %vm118_vm5, %v120_v9, %v298_v5  ;;  %v411_v21 = vmov 16.0  }
  0x1d   :  { %v129_v16 = vsel %vm125_vm6, %v127_v10, %v299_v11 }
  0x1e   :  { %v130_v18 = vadd.f32 %v129_v16, %v122_v15 }
  0x20   :  { %v327_v46 = vpop.eup %326  ;;  %v131_v19 = vmul.f32 %v436_v8, %v130_v18 }
  0x21   :  { %v95_v50 = vadd.f32 1.0, %v327_v46 }
  0x22   :  { %v329_v49 = vpop.eup %328 }
  0x23   :  { %v104_v53 = vadd.f32 1.0, %v329_v49  ;;  %330 = vlog2.f32 %v95_v50 }
  0x25   :  { %332 = vlog2.f32 %v104_v53 }
  0x26   :  { %334 = vrcp.f32 %v411_v21 }
  0x29   :  { %v331_v0 = vpop.eup %330 }
  0x2a   :  { %v97_v3 = vmul.f32 0.6931472, %v331_v0 }
  0x2b   :  { %v333_v2 = vpop.eup %332 }
  0x2c   :  { %v106_v4 = vmul.f32 0.6931472, %v333_v2  ;;  %v98_v6 = vadd.f32 %v97_v3, %v90_v60  ;;  %v335_v7 = vpop.eup %334 }
  0x2d   :  { %v226_v34 = vmul.f32 16.0, %v335_v7  ;;  %vm230_vm7 = vweird.f32 %v335_v7 }
  0x2e   :  { %v107_v12 = vadd.f32 %v106_v4, %v99_v1 }
  0x2f   :  { %v227_v41 = vsub.f32 1.0, %v226_v34 }
  0x30   :  { %v108_v14 = vadd.f32 %v107_v12, %v98_v6 }
  0x31   :  { %v228_v48 = vmul.f32 %v335_v7, %v227_v41 }
  0x32   :  { %v109_v17 = vmul.f32 %v295_v13, %v108_v14 }
  0x33   :  { %v229_v54 = vadd.f32 %v335_v7, %v228_v48 }
  0x34   :  { %176 = vadd.xlane.f32.xlu0 %v109_v17 }
  0x35   :  { %v231_v59 = vsel %vm230_vm7, %v335_v7, %v229_v54 }
  0x3c   :  { %186 = vadd.xlane.f32.xlu0 %v131_v19 }
  0x82   :  { %v197_v20 = vpop.xlane.xlu1 %196 }
  0x83   :  { %v198_v24 = vrot.slane %v197_v20, 4 }
  0x85   :  { %v217_v23 = vpop.xlane.xlu2 %216  ;;  %v199_v30 = vadd.f32 %v198_v24, %v197_v20 }
  0x86   :  { %v218_v28 = vrot.slane %v217_v23, 4 }
  0x87   :  { %v200_v8 = vrot.slane %v199_v30, 2 }
  0x88   :  { %v219_v33 = vadd.f32 %v218_v28, %v217_v23 }
  0x89   :  { %v201_v44 = vadd.f32 %v200_v8, %v199_v30 }
  0x8a   :  { %v220_v40 = vrot.slane %v219_v33, 2 }
  0x8b   :  { %v202_v50 = vrot.slane %v201_v44, 1 }
  0x8c   :  { %v221_v47 = vadd.f32 %v220_v40, %v219_v33 }
  0x8d   :  { %v203_v56 = vadd.f32 %v202_v50, %v201_v44 }
  0x8e   :  { %v222_v53 = vrot.slane %v221_v47, 1 }
  0x8f   :  { %v207_v22 = vpop.xlane.xlu1 %206 }
  0x90   :  { %v208_v27 = vrot.slane %v207_v22, 4  ;;  %v223_v58 = vadd.f32 %v222_v53, %v221_v47 }
  0x92   :  { %v209_v32 = vadd.f32 %v208_v27, %v207_v22 }
  0x94   :  { %v210_v37 = vrot.slane %v209_v32, 2 }
  0x96   :  { %v211_v45 = vadd.f32 %v210_v37, %v209_v32 }
  0x98   :  { %v212_v52 = vrot.slane %v211_v45, 1 }
  0x9a   :  { %v213_v57 = vadd.f32 %v212_v52, %v211_v45 }
  0xa7   :  { %v177_v25 = vpop.xlane.xlu0 %176 }
  0xa8   :  { %v178_v26 = vrot.slane %v177_v25, 4 }
  0xaa   :  { %v179_v29 = vadd.f32 %v178_v26, %v177_v25 }
  0xac   :  { %v180_v31 = vrot.slane %v179_v29, 2 }
  0xae   :  { %v181_v35 = vadd.f32 %v180_v31, %v179_v29 }
  0xaf   :  { %v187_v36 = vpop.xlane.xlu0 %186 }
  0xb0   :  { %v188_v38 = vrot.slane %v187_v36, 4  ;;  %v182_v39 = vrot.slane %v181_v35, 1 }
  0xb2   :  { %v189_v42 = vadd.f32 %v188_v38, %v187_v36  ;;  %v183_v43 = vadd.f32 %v182_v39, %v181_v35 }
  0xb4   :  { %v190_v46 = vrot.slane %v189_v42, 2  ;;  %302 = vpush %v183_v43 }
  0xb6   :  { %v191_v49 = vadd.f32 %v190_v46, %v189_v42 }
  0xb8   :  { %v192_v51 = vrot.slane %v191_v49, 1 }
  0xba   :  { %v193_v55 = vadd.f32 %v192_v51, %v191_v49 }
  0xbc   :  { %304 = vpush %v193_v55 }
  0xbd   :  { %306 = vpush %v203_v56 }
  0xbe   :  { %308 = vpush %v213_v57 }
  0xbf   :  { %310 = vpush %v223_v58 }
  0xc0   :  { %312 = vpush %v231_v59 }
  0xe5   :  { %s442_s0 = spop %302 }
  0xed   :  { %s444_s1 = spop %304 }
  0xee   :  { %s446_s21 = spop %306 }
  0xef   :  { %s235_s23 = smax.f32 %s412_s22, %s446_s21  ;;  %s449_s24 = spop %308 }
  0xf0   :  { %v236_v60 = vstv %s235_s23  ;;  %s451_s25 = spop %310  ;;  %p234_p0 = scmp.gt.f32.partialorder %s446_s21, 0.0 }
  0xf1   :  { %336 = vrcp.f32 %v236_v60  ;;  %s255_s26 = smax.f32 %s412_s22, %s451_s25  ;;  %v248_v3 = vand.u32 2147483648, %v236_v60  ;;  %v246_v5 = vand.u32 2147483647, %v236_v60  ;;  %vm242_vm9 = vweird.f32 %v236_v60  ;;  %s313_s27 = spop %312 }
  0xf2   :  { %v256_v61 = vstv %s255_s26  ;;  %s233_s30 = smul.f32 %s313_s27, %s442_s0  ;;  %p254_p1 = scmp.gt.f32.partialorder %s451_s25, 0.0 }
  0xf3   :  { %338 = vrcp.f32 %v256_v61  ;;  %v268_v10 = vand.u32 2147483648, %v256_v61  ;;  %v249_v11 = vor.u32 1.1754944e-38, %v248_v3  ;;  %v266_v13 = vand.u32 2147483647, %v256_v61 }
  0xf4   :  { %vm247_vm12 = vcmp.eq.f32.partialorder %v246_v5, 8.507059e+37  ;;  %vm262_vm13 = vweird.f32 %v256_v61 }
  0xf5   :  { %v269_v17 = vor.u32 1.1754944e-38, %v268_v10  ;;  %vm267_vm15 = vcmp.eq.f32.partialorder %v266_v13, 8.507059e+37 }
  0xf7   :  { %v337_v62 = vpop.eup %336 }
  0xf8   :  { %v238_v63 = vmul.f32 %v337_v62, %v236_v60  ;;  %vm243_vm8 = vweird.f32 %v337_v62 }
  0xf9   :  { %v339_v0 = vpop.eup %338  ;;  %vm244_vm10 = vmor %vm242_vm9, %vm243_vm8 }
  0xfa   :  { %v239_v1 = vsub.f32 1.0, %v238_v63  ;;  %v258_v2 = vmul.f32 %v339_v0, %v256_v61  ;;  %vm263_vm11 = vweird.f32 %v339_v0 }
  0xfb   :  { %vm264_vm14 = vmor %vm262_vm13, %vm263_vm11 }
  0xfc   :  { %v240_v4 = vmul.f32 %v337_v62, %v239_v1  ;;  %v259_v6 = vsub.f32 1.0, %v258_v2 }
  0xfe   :  { %v241_v9 = vadd.f32 %v337_v62, %v240_v4  ;;  %v260_v12 = vmul.f32 %v339_v0, %v259_v6 }
 0x100   :  { %v245_v14 = vsel %vm244_vm10, %v337_v62, %v241_v9  ;;  %v261_v16 = vadd.f32 %v339_v0, %v260_v12 }
 0x101   :  { %v250_v15 = vsel %vm247_vm12, %v249_v11, %v245_v14 }
 0x102   :  { %314 = vpush %v250_v15  ;;  %v265_v18 = vsel %vm264_vm14, %v339_v0, %v261_v16 }
 0x103   :  { %v270_v19 = vsel %vm267_vm15, %v269_v17, %v265_v18 }
 0x104   :  { %316 = vpush %v270_v19 }
 0x133   :  { %s315_s28 = spop %314 }
 0x134   :  { %s252_s29 = smul.f32 %s315_s28, %s444_s1 }
 0x135   :  { %s317_s3 = spop %316 }
 0x136   :  { %s466_s29 = smov (!%p234_p0, %s252_s29), 0.0  ;;  %s272_s5 = smul.f32 %s317_s3, %s449_s24 }
 0x137   :  { %s274_s4 = sadd.f32 %s466_s29, %s233_s30 }
 0x138   :  { %s468_s5 = smov (!%p254_p1, %s272_s5), 0.0 }
 0x139   :  { %s275_s9 = sadd.f32 %s274_s4, %s468_s5 }
 0x13b   :  { %277 = sst [smem:[#allocation8]] %s275_s9 }
 0x13c   :  { %286 = dma.smem_to_hbm %s413_s10, 16, %s284_s8, [#allocation5]  }
 0x13d   :  { %404 = dma.done.wait [#allocation5], 16  }
 0x13e   :  { %405 = vsyncadd [#allocation5], 4294967280 }
 0x13f   :  { %291 = sfence }
 0x140   :  { %292 = vsyncpa [#allocation4], 1 }
 0x141   :  { %293 = vsyncpa [#allocation7], 1 }
 0x142   :  { %294 = vsyncpa [#allocation5], 1 }

</bundles_post_ra>
